<compile_context>
chip_gen: v7x
topology: tpu7x:2x2x1
jax: 0.10.0
libtpu: 0.0.40
codegen_flags: <defaults>
</compile_context>

<pallas_src>
import jax
import jax.numpy as jnp
from jax.experimental import pallas as pl
from jax.experimental.pallas import tpu as pltpu


def alpha_kernel(x_ref, w_ref, o_ref):
    # Broadcast multiply (tile_b, tile_c) * (1, tile_c); input cast is a free
    # VPU op done per-tile so HBM reads stay in the source dtype.
    o_ref[...] = x_ref[...].astype(o_ref.dtype) * w_ref[...]


def _round_up(x, m):
    return ((x + m - 1) // m) * m


def _chip_gen():
    try:
        kind = jax.devices()[0].device_kind.lower()
    except Exception:
        return None
    for gen in ("v7", "v6", "v5"):
        if gen in kind:
            return gen
    return None


def alpha_forward(x, weight, *, tile_b=None, tile_c=None):
    """x: (B, C); weight: (C, 1) float16 (PyTorch parameter layout)."""
    B, C = x.shape
    assert weight.shape == (C, 1)

    # Match PyTorch type promotion (e.g. f32 * f16 -> f32). Only the tiny
    # weight row is cast in the wrapper; x is cast inside the kernel.
    out_dtype = jnp.promote_types(x.dtype, weight.dtype)
    out_itemsize = jnp.dtype(out_dtype).itemsize
    w_row = weight.reshape(1, C).astype(out_dtype)  # (1, C)

    gen = _chip_gen()
    if gen == "v7":
        target_block_bytes = 6 * 1024 * 1024
        vmem_limit_bytes = 40 << 20  # 4 live blocks (~24 MiB) + weight, < 64 MiB phys
    elif gen == "v6":
        target_block_bytes = 4 * 1024 * 1024  # 4 x 4 MiB = 16 MiB < 32 MiB default
        vmem_limit_bytes = None
    else:  # v5e or unknown backend: stay well under the 16 MiB scoped default
        target_block_bytes = 2 * 1024 * 1024
        vmem_limit_bytes = None

    # ---- class (lane) tiling: full row when feasible, multiples of 128 -----
    c128 = _round_up(C, 128)
    if tile_c is None:
        tile_c = c128 if c128 <= 16384 else 8192

    # ---- batch (sublane) tiling: chip-sized blocks, multiple of 8 rows -----
    if tile_b is None:
        rows = (target_block_bytes // (tile_c * out_itemsize)) // 8 * 8
        rows = max(8, min(rows, 1024))
        tile_b = min(rows, _round_up(B, 8))
        # v7x megacore: make sure the batch (parallel) axis has >= 2 steps for
        # large B so both TensorCores stream from HBM.
        if gen == "v7" and B >= 128 and pl.cdiv(B, tile_b) == 1:
            tile_b = max(8, _round_up(pl.cdiv(B, 2), 8))
    assert tile_b % 8 == 0 and tile_c % 128 == 0

    grid = (pl.cdiv(B, tile_b), pl.cdiv(C, tile_c))

    compiler_kwargs = dict(
        # Both axes independent -> megacore sharding on v7x, double-buffered
        # pipelining everywhere.
        dimension_semantics=("parallel", "parallel"),
    )
    if vmem_limit_bytes is not None:
        compiler_kwargs["vmem_limit_bytes"] = vmem_limit_bytes

    out = pl.pallas_call(
        alpha_kernel,
        out_shape=jax.ShapeDtypeStruct((B, C), out_dtype),
        grid_spec=pltpu.PrefetchScalarGridSpec(
            num_scalar_prefetch=0,
            grid=grid,
            in_specs=[
                # x tile; consider pipeline_mode=pl.Buffered(3) if a profile
                # shows exposed input DMA on v7x.
                pl.BlockSpec((tile_b, tile_c), lambda i, j: (i, j)),
                # weight row: re-used across all batch steps (j usually == 0).
                pl.BlockSpec((1, tile_c), lambda i, j: (0, j)),
            ],
            out_specs=pl.BlockSpec((tile_b, tile_c), lambda i, j: (i, j)),
        ),
        compiler_params=pltpu.CompilerParams(**compiler_kwargs),
    )(x, w_row)

    return out


if __name__ == "__main__":
    key = jax.random.PRNGKey(0)

    # Case 1: aligned shapes (mirrors Alpha.__init__ with num_classes=128).
    num_classes, alpha, batch = 128, 0.75, 8
    weight = (alpha * jnp.ones((num_classes, 1))).astype(jnp.float16)
    k1, k2 = jax.random.split(key)
    x = jax.random.normal(k1, (batch, num_classes), dtype=jnp.float32)
    out = jax.block_until_ready(alpha_forward(x, weight))
    ref = x * weight.T.astype(jnp.float32)
    assert out.shape == (batch, num_classes) and out.dtype == jnp.float32
    assert jnp.allclose(out, ref, atol=1e-6, rtol=1e-6)

    # Case 2: unaligned batch / num_classes (exercises masked edge blocks —
    # no wrapper padding / slicing anymore).
    num_classes2, alpha2, batch2 = 200, 0.5, 12
    weight2 = (alpha2 * jnp.ones((num_classes2, 1))).astype(jnp.float16)
    x2 = jax.random.normal(k2, (batch2, num_classes2), dtype=jnp.float32)
    out2 = jax.block_until_ready(alpha_forward(x2, weight2))
    ref2 = x2 * weight2.T.astype(jnp.float32)
    assert out2.shape == (batch2, num_classes2) and out2.dtype == jnp.float32
    assert jnp.allclose(out2, ref2, atol=1e-6, rtol=1e-6)

    # Case 3: 16-bit input exercises the in-kernel promotion path.
    x3 = jax.random.normal(k2, (batch2, num_classes2), dtype=jnp.bfloat16)
    out3 = jax.block_until_ready(alpha_forward(x3, weight2))
    ref3 = x3.astype(jnp.float32) * weight2.T.astype(jnp.float32)
    assert out3.dtype == jnp.float32
    assert jnp.allclose(out3, ref3, atol=1e-2, rtol=1e-2)

    print("KERNEL_OK")
</pallas_src>

<mosaic_0001>
module attributes {stable_mosaic.version = 11 : i64} {
  func.func @alpha_kernel(%arg0: i32, %arg1: i32, %arg2: memref<8x128xf32, #tpu.memory_space<vmem>>, %arg3: memref<1x128xf32, #tpu.memory_space<vmem>>, %arg4: memref<8x128xf32, #tpu.memory_space<vmem>>) attributes {dimension_semantics = [#tpu.dimension_semantics<parallel>, #tpu.dimension_semantics<parallel>], iteration_bounds = array<i64: 1, 1>, scalar_prefetch = 0 : i64, scratch_operands = 0 : i64, tpu.core_type = #tpu.core_type<tc>, window_params = [{transform_indices = @transform_0, window_bounds = array<i64: 8, 128>}, {transform_indices = @transform_1, window_bounds = array<i64: 1, 128>}, {transform_indices = @transform_2, window_bounds = array<i64: 8, 128>}]} {
    %c0 = arith.constant 0 : index
    %c0_0 = arith.constant 0 : index
    %0 = vector.load %arg2[%c0, %c0_0] : memref<8x128xf32, #tpu.memory_space<vmem>>, vector<8x128xf32>
    %c0_1 = arith.constant 0 : index
    %c0_2 = arith.constant 0 : index
    %1 = vector.load %arg3[%c0_1, %c0_2] : memref<1x128xf32, #tpu.memory_space<vmem>>, vector<1x128xf32>
    %2 = vector.broadcast %1 : vector<1x128xf32> to vector<8x128xf32>
    %3 = arith.mulf %0, %2 : vector<8x128xf32>
    %c0_3 = arith.constant 0 : index
    %c0_4 = arith.constant 0 : index
    %4 = vector.load %arg4[%c0_3, %c0_4] : memref<8x128xf32, #tpu.memory_space<vmem>>, vector<8x128xf32>
    tpu.vector_store %arg4[%c0_3, %c0_4], %3 {strides = array<i32>} : memref<8x128xf32, #tpu.memory_space<vmem>>, vector<8x128xf32>,
    return
  }
  func.func @transform_0(%arg0: i32, %arg1: i32) -> (i32, i32) {
    %c0_i32 = arith.constant 0 : i32
    return %arg0, %arg1 : i32, i32
  }
  func.func @transform_1(%arg0: i32, %arg1: i32) -> (i32, i32) {
    %c0_i32 = arith.constant 0 : i32
    %c0_i32_0 = arith.constant 0 : i32
    return %c0_i32, %arg1 : i32, i32
  }
  func.func @transform_2(%arg0: i32, %arg1: i32) -> (i32, i32) {
    %c0_i32 = arith.constant 0 : i32
    return %arg0, %arg1 : i32, i32
  }
}

</mosaic_0001>

<bundles_post_ra>
// kernel: tpu_custom_call.1
= control target key start
LH: loop header
LB: loop body
LE: loop exit
PB: predicated region body
PF: predicated region fallthrough
CT: control target
= control target key end

     0   :  { %7 = vsyncpa [#allocation3], 0  ;;  %s144_s0 = inlined_call_operand.hbm [shape: f32[8,128], index: 0, kind: input, shape index: {}]   ;;  %s145_s1 = inlined_call_operand.vmem [shape: f32[1,128], index: 1, kind: input, shape index: {}]   ;;  %s146_s2 = inlined_call_operand.hbm [shape: f32[8,128], index: 2, kind: output, shape index: {}]  }
   0x1   :  { %8 = vsyncpa [#allocation4], 0  ;;  %s100_s9 = smov [#allocation2]   ;;  %s52_s13 = scalar_lea.hbm %s144_s0, 128 }
   0x2   :  { %s15_s10 = sshll.u32 %s100_s9, 4  ;;  %p53_p0 = scmp.ne.s32.totalorder %s144_s0, %s52_s13  ;;  %s16_s10 = int_to_ptr.vmem [resolvable:$true] %s15_s10 }
   0x3   :  { %p56_p1 = scmp.lt.u32.totalorder %s52_s13, %s144_s0 }
   0x5   :  { %p58_p2 = pnand %p56_p1, %p53_p0 }
   0x7   :  { %61 = shalt.err (!%p58_p2)
}
   0x8   :  { %s62_s18 = scalar_lea.vmem %s16_s10, 128  ;;  %p67_p4 = scmp.lt.s32.totalorder %s16_s10, %s16_s10 }
   0x9   :  { %p63_p3 = scmp.ne.s32.totalorder %s16_s10, %s62_s18  ;;  %p68_p5 = scmp.lt.s32.totalorder %s62_s18, %s62_s18 }
   0xb   :  { %p69_p6 = por %p68_p5, %p67_p4 }
   0xd   :  { %p70_p7 = pnand %p69_p6, %p63_p3 }
   0xf   :  { %73 = shalt.err (!%p70_p7)
}
  0x10   :  { %18 = dma.hbm_to_vmem [thread:$0]  %s144_s0, 128, %s16_s10, [#allocation3]  }
  0x11   :  { %96 = dma.done.wait [#allocation3], 128  }
  0x12   :  { %97 = vsyncadd [#allocation3], 4294967168  ;;  %s101_s21 = smov [#allocation5]   ;;  %v24_v0 = vld [vmem:[#allocation2] sm:$0xff] }
  0x13   :  { %s40_s22 = sshll.u32 %s101_s21, 4  ;;  %v49_v1 = vld [vmem:[%s145_s1] ss:$0 sm:$0xff]  ;;  %s41_s22 = int_to_ptr.vmem [resolvable:$true] %s40_s22 }
  0x14   :  { %v32_v2 = vmul.f32 %v49_v1, %v24_v0  ;;  %s74_s25 = scalar_lea.vmem %s41_s22, 128  ;;  %p79_p9 = scmp.lt.s32.totalorder %s41_s22, %s41_s22 }
  0x15   :  { %p75_p8 = scmp.ne.s32.totalorder %s41_s22, %s74_s25  ;;  %p80_p10 = scmp.lt.s32.totalorder %s74_s25, %s74_s25 }
  0x16   :  { %33 = vst [vmem:[#allocation5] sm:$0xff] %v32_v2 }
  0x17   :  { %p81_p11 = por %p80_p10, %p79_p9 }
  0x19   :  { %p82_p12 = pnand %p81_p11, %p75_p8 }
  0x1b   :  { %85 = shalt.err (!%p82_p12)
}
  0x1c   :  { %s86_s27 = scalar_lea.hbm %s146_s2, 128 }
  0x1d   :  { %p87_p13 = scmp.ne.s32.totalorder %s146_s2, %s86_s27  ;;  %p90_p0 = scmp.lt.u32.totalorder %s86_s27, %s146_s2 }
  0x1f   :  { %p92_p1 = pnand %p90_p0, %p87_p13 }
  0x21   :  { %95 = shalt.err (!%p92_p1)
}
  0x22   :  { %43 = dma.vmem_to_hbm [thread:$0]  %s41_s22, 128, %s146_s2, [#allocation4]  }
  0x23   :  { %98 = dma.done.wait [#allocation4], 128  }
  0x24   :  { %99 = vsyncadd [#allocation4], 4294967168 }
  0x25   :  { %47 = vsyncpa [#allocation3], 1 }
  0x26   :  { %48 = vsyncpa [#allocation4], 1 }

</bundles_post_ra>
